<compile_context>
chip_gen: v5e
topology: v5e:2x2
jax: 0.10.0
libtpu: 0.0.40
codegen_flags: <defaults>
</compile_context>

<pallas_src>
import functools

import jax
import jax.numpy as jnp
from jax.experimental import pallas as pl
from jax.experimental.pallas import tpu as pltpu


def _round_up(x, m):
    return (x + m - 1) // m * m


# Tile caps (bf16 inputs, f32 resident output), sized for <=~16 MiB VMEM:
#   x: 2*TM*TK*2 = 4 MiB, W: 2*TK*TN*2 = 8 MiB, out: 2*TM*TN*4 = 4 MiB
_TM_MAX = 512
_TN_MAX = 1024   # full-N single j-block for typical classifier heads
_TK_MAX = 2048   # full-K single reduction step for typical input_size


def _pick_lane_tile(dim_p, max_tile):
    """dim_p is a multiple of 128.  Return the full dim if it fits, else the
    largest power-of-two multiple of 128 <= max_tile that divides dim_p."""
    if dim_p <= max_tile:
        return dim_p
    t = max_tile
    while t > 128 and dim_p % t != 0:
        t //= 2
    return t


def _pick_m_tile(M):
    """Pick (tm, Mp): pad M to 8 when it fits a single tile, otherwise pick the
    largest tile in {512,256,128} whose padding waste is modest."""
    Mp = _round_up(M, 8)
    if Mp <= _TM_MAX:
        return Mp, Mp
    for t in (512, 256, 128):
        Mp = _round_up(M, t)
        if Mp - M <= max(M // 4, 8):
            return t, Mp
    return 128, _round_up(M, 128)


def _classifier_kernel(x_ref, w_ref, b_ref, o_ref, *acc, activation):
    # x_ref: [tm, tk] (bf16/f32)   w_ref: [tk, tn] (pre-transposed [IN, OUT])
    # b_ref: [1, tn] f32           o_ref: [tm, tn]
    # acc: () when o_ref is f32 (accumulate directly into the VMEM-resident
    #      output block), otherwise a single f32 scratch ref.
    acc_ref = acc[0] if acc else o_ref
    k = pl.program_id(2)

    @pl.when(k == 0)
    def _():
        acc_ref[...] = jnp.zeros_like(acc_ref)

    # MXU matmul (bf16 in, f32 accumulation). No transpose inside the kernel.
    acc_ref[...] += jnp.dot(x_ref[...], w_ref[...],
                            preferred_element_type=jnp.float32)

    # Epilogue only on the last K step: bias add + activation (+ cast/store).
    @pl.when(k == pl.num_programs(2) - 1)
    def _():
        out = acc_ref[...] + b_ref[...]
        if activation == "tanh":
            out = jnp.tanh(out)
        elif activation == "relu":
            out = jnp.maximum(out, 0.0)
        # activation is None -> identity (matches the module default)
        o_ref[...] = out.astype(o_ref.dtype)


@functools.partial(jax.jit, static_argnames=("N", "activation", "compute_dtype"))
def _classifier_forward(x, wt_p, b2d, *, N, activation, compute_dtype):
    """x: [M, K]; wt_p: [Kp, Np] pre-transposed/padded/cast weight; b2d: [1, Np] f32."""
    M, K = x.shape
    Kp, Np = wt_p.shape

    tm, Mp = _pick_m_tile(M)
    tk = _pick_lane_tile(Kp, _TK_MAX)
    tn = _pick_lane_tile(Np, _TN_MAX)

    out_dtype = x.dtype

    x_p = x
    if (Mp, Kp) != (M, K):
        x_p = jnp.pad(x, ((0, Mp - M), (0, Kp - K)))
    x_p = x_p.astype(compute_dtype)

    grid = (Mp // tm, Np // tn, Kp // tk)

    # Only allocate an accumulator scratch if we cannot accumulate in-place in
    # the (VMEM-resident across k) output block.
    use_scratch = out_dtype != jnp.float32
    scratch_shapes = [pltpu.VMEM((tm, tn), jnp.float32)] if use_scratch else []

    kernel = functools.partial(_classifier_kernel, activation=activation)
    out_p = pl.pallas_call(
        kernel,
        out_shape=jax.ShapeDtypeStruct((Mp, Np), out_dtype),
        grid_spec=pltpu.PrefetchScalarGridSpec(
            num_scalar_prefetch=0,
            grid=grid,
            in_specs=[
                pl.BlockSpec((tm, tk), lambda i, j, k: (i, k)),   # x tile
                pl.BlockSpec((tk, tn), lambda i, j, k: (k, j)),   # W^T tile
                # TODO(synk): bump to pipeline_mode=pl.Buffered(3) if a trace
                # shows exposed DMA on long-K problems.
                pl.BlockSpec((1, tn), lambda i, j, k: (0, j)),    # bias (j only)
            ],
            out_specs=pl.BlockSpec((tm, tn), lambda i, j, k: (i, j)),
            scratch_shapes=scratch_shapes,
        ),
        compiler_params=pltpu.CompilerParams(
            dimension_semantics=("parallel", "parallel", "arbitrary"),
            vmem_limit_bytes=32 * 1024 * 1024,
        ),
    )(x_p, wt_p, b2d)

    return out_p[:M, :N]


def make_classifier(w, b, activation=None, compute_dtype=jnp.bfloat16):
    """One-time weight prep (transpose + pad + cast), hoisted out of the
    per-call forward path.  Returns forward(x) = activation(x @ W^T + b).

    w: [output_size, input_size]  (PyTorch nn.Linear weight layout)
    b: [output_size]
    activation: None | "tanh" | "relu"
    """
    N, K = w.shape
    Kp = _round_up(K, 128)
    Np = _round_up(N, 128)

    wt = jnp.asarray(w).T                                        # [K, N]
    wt_p = jnp.pad(wt, ((0, Kp - K), (0, Np - N))).astype(compute_dtype)
    b_p = jnp.pad(jnp.asarray(b, jnp.float32), (0, Np - N)).reshape(1, Np)

    # TODO(synk): for dropout_rate > 0 (training mode), apply a
    # pltpu.prng_seed / pltpu.stateful_bernoulli mask to x inside the kernel;
    # the module default p=0.0 is the identity and needs none.
    def forward(x):
        return _classifier_forward(x, wt_p, b_p, N=N,
                                   activation=activation,
                                   compute_dtype=compute_dtype)

    return forward


if __name__ == "__main__":
    key = jax.random.PRNGKey(0)

    def make_params(k, input_size, output_size):
        kw, kb = jax.random.split(k)
        bound = 1.0 / jnp.sqrt(jnp.float32(input_size))
        w = jax.random.uniform(kw, (output_size, input_size), jnp.float32,
                               minval=-bound, maxval=bound)
        b = jax.random.uniform(kb, (output_size,), jnp.float32,
                               minval=-bound, maxval=bound)
        return w, b

    def ref_forward(x, w, b, activation):
        # Reference uses the same bf16-in / f32-accumulate numerics as the kernel.
        y = jnp.dot(x.astype(jnp.bfloat16), w.T.astype(jnp.bfloat16),
                    preferred_element_type=jnp.float32) + b
        if activation == "tanh":
            y = jnp.tanh(y)
        elif activation == "relu":
            y = jnp.maximum(y, 0.0)
        return y

    k1, k2, k3, k4, k5 = jax.random.split(key, 5)

    # Case 1: tiny module-default shapes Classifier(32, 16), activation=None,
    # dropout_rate=0.0 -> exercises the padding path (single grid point).
    x1 = jax.random.normal(k1, (8, 32), dtype=jnp.float32)
    w1, b1 = make_params(k2, 32, 16)
    out1 = jax.block_until_ready(make_classifier(w1, b1, activation=None)(x1))
    assert out1.shape == (8, 16)
    assert jnp.allclose(out1, ref_forward(x1, w1, b1, None),
                        atol=1e-3, rtol=1e-3), "mismatch (case 1)"

    # Case 2: moderate classifier head -> full-N / full-K single-shot tile.
    x2 = jax.random.normal(k3, (256, 1024), dtype=jnp.float32)
    w2, b2 = make_params(k4, 1024, 384)
    out2 = jax.block_until_ready(make_classifier(w2, b2, activation="tanh")(x2))
    assert out2.shape == (256, 384)
    assert jnp.allclose(out2, ref_forward(x2, w2, b2, "tanh"),
                        atol=1e-3, rtol=1e-3), "mismatch (case 2)"

    # Case 3: non-power-of-two shapes -> multi-block (i, j, k) grid with the
    # in-place K accumulator and epilogue gating (grid = (1, 5, 9)).
    x3 = jax.random.normal(k5, (130, 2304), dtype=jnp.float32)
    w3, b3 = make_params(jax.random.PRNGKey(1), 2304, 1280)
    out3 = jax.block_until_ready(make_classifier(w3, b3, activation="relu")(x3))
    assert out3.shape == (130, 1280)
    assert jnp.allclose(out3, ref_forward(x3, w3, b3, "relu"),
                        atol=2e-3, rtol=2e-3), "mismatch (case 3)"

    print("KERNEL_OK")
</pallas_src>

<mosaic_0001>
module attributes {stable_mosaic.version = 11 : i64} {
  func.func @_classifier_kernel(%arg0: i32, %arg1: i32, %arg2: i32, %arg3: memref<8x128xbf16, #tpu.memory_space<vmem>>, %arg4: memref<128x128xbf16, #tpu.memory_space<vmem>>, %arg5: memref<1x128xf32, #tpu.memory_space<vmem>>, %arg6: memref<8x128xf32, #tpu.memory_space<vmem>>) attributes {dimension_semantics = [#tpu.dimension_semantics<parallel>, #tpu.dimension_semantics<parallel>, #tpu.dimension_semantics<arbitrary>], iteration_bounds = array<i64: 1, 1, 1>, scalar_prefetch = 0 : i64, scratch_operands = 0 : i64, tpu.core_type = #tpu.core_type<tc>, window_params = [{transform_indices = @transform_0, window_bounds = array<i64: 8, 128>}, {transform_indices = @transform_1, window_bounds = array<i64: 128, 128>}, {transform_indices = @transform_2, window_bounds = array<i64: 1, 128>}, {transform_indices = @transform_3, window_bounds = array<i64: 8, 128>}]} {
    %c0_i32 = arith.constant 0 : i32
    %0 = arith.cmpi eq, %arg2, %c0_i32 : i32
    %1 = arith.extui %0 : i1 to i32
    %c0_i32_0 = arith.constant 0 : i32
    %2 = arith.cmpi ne, %1, %c0_i32_0 : i32
    scf.if %2 {
      %cst_10 = arith.constant 0.000000e+00 : f32
      %12 = vector.broadcast %cst_10 : f32 to vector<8x128xf32>
      %c0_11 = arith.constant 0 : index
      %c0_12 = arith.constant 0 : index
      %13 = vector.load %arg6[%c0_11, %c0_12] : memref<8x128xf32, #tpu.memory_space<vmem>>, vector<8x128xf32>
      tpu.vector_store %arg6[%c0_11, %c0_12], %12 {strides = array<i32>} : memref<8x128xf32, #tpu.memory_space<vmem>>, vector<8x128xf32>,
    } else {
    }
    %c0 = arith.constant 0 : index
    %c0_1 = arith.constant 0 : index
    %3 = vector.load %arg6[%c0, %c0_1] : memref<8x128xf32, #tpu.memory_space<vmem>>, vector<8x128xf32>
    %c0_2 = arith.constant 0 : index
    %c0_3 = arith.constant 0 : index
    %4 = vector.load %arg3[%c0_2, %c0_3] : memref<8x128xbf16, #tpu.memory_space<vmem>>, vector<8x128xbf16>
    %c0_4 = arith.constant 0 : index
    %c0_5 = arith.constant 0 : index
    %5 = vector.load %arg4[%c0_4, %c0_5] : memref<128x128xbf16, #tpu.memory_space<vmem>>, vector<128x128xbf16>
    %cst = arith.constant dense<0.000000e+00> : vector<8x128xf32>
    %6 = tpu.matmul %4, %5, %cst {dimension_numbers = #tpu.dot_dimension_numbers<[1], [0], [0], [1], [0, 0, 1, 1], [], []>} : vector<8x128xbf16>, vector<128x128xbf16>, vector<8x128xf32> -> vector<8x128xf32>
    %7 = arith.addf %3, %6 : vector<8x128xf32>
    %c0_6 = arith.constant 0 : index
    %c0_7 = arith.constant 0 : index
    %8 = vector.load %arg6[%c0_6, %c0_7] : memref<8x128xf32, #tpu.memory_space<vmem>>, vector<8x128xf32>
    tpu.vector_store %arg6[%c0_6, %c0_7], %7 {strides = array<i32>} : memref<8x128xf32, #tpu.memory_space<vmem>>, vector<8x128xf32>,
    %c0_i32_8 = arith.constant 0 : i32
    %9 = arith.cmpi eq, %arg2, %c0_i32_8 : i32
    %10 = arith.extui %9 : i1 to i32
    %c0_i32_9 = arith.constant 0 : i32
    %11 = arith.cmpi ne, %10, %c0_i32_9 : i32
    scf.if %11 {
      %c0_10 = arith.constant 0 : index
      %c0_11 = arith.constant 0 : index
      %12 = vector.load %arg6[%c0_10, %c0_11] : memref<8x128xf32, #tpu.memory_space<vmem>>, vector<8x128xf32>
      %c0_12 = arith.constant 0 : index
      %c0_13 = arith.constant 0 : index
      %13 = vector.load %arg5[%c0_12, %c0_13] : memref<1x128xf32, #tpu.memory_space<vmem>>, vector<1x128xf32>
      %14 = vector.broadcast %13 : vector<1x128xf32> to vector<8x128xf32>
      %15 = arith.addf %12, %14 : vector<8x128xf32>
      %c0_14 = arith.constant 0 : index
      %c0_15 = arith.constant 0 : index
      %16 = vector.load %arg6[%c0_14, %c0_15] : memref<8x128xf32, #tpu.memory_space<vmem>>, vector<8x128xf32>
      tpu.vector_store %arg6[%c0_14, %c0_15], %15 {strides = array<i32>} : memref<8x128xf32, #tpu.memory_space<vmem>>, vector<8x128xf32>,
    } else {
    }
    return
  }
  func.func @transform_0(%arg0: i32, %arg1: i32, %arg2: i32) -> (i32, i32) {
    %c0_i32 = arith.constant 0 : i32
    return %arg0, %arg2 : i32, i32
  }
  func.func @transform_1(%arg0: i32, %arg1: i32, %arg2: i32) -> (i32, i32) {
    %c0_i32 = arith.constant 0 : i32
    return %arg2, %arg1 : i32, i32
  }
  func.func @transform_2(%arg0: i32, %arg1: i32, %arg2: i32) -> (i32, i32) {
    %c0_i32 = arith.constant 0 : i32
    %c0_i32_0 = arith.constant 0 : i32
    return %c0_i32, %arg1 : i32, i32
  }
  func.func @transform_3(%arg0: i32, %arg1: i32, %arg2: i32) -> (i32, i32) {
    %c0_i32 = arith.constant 0 : i32
    return %arg0, %arg1 : i32, i32
  }
}

</mosaic_0001>

<bundles_post_ra>
// kernel: _classifier_forward.1
= control target key start
LH: loop header
LB: loop body
LE: loop exit
PB: predicated region body
PF: predicated region fallthrough
CT: control target
= control target key end

     0   :  { %8 = vsyncpa [#allocation3], 0  ;;  %s278_s0 = inlined_call_operand.vmem [shape: bf16[8,128], index: 0, kind: input, shape index: {}]   ;;  %s279_s1 = inlined_call_operand.hbm [shape: bf16[128,128], index: 1, kind: input, shape index: {}]   ;;  %s280_s2 = inlined_call_operand.vmem [shape: f32[1,128], index: 2, kind: input, shape index: {}]   ;;  %s281_s3 = inlined_call_operand.hbm [shape: f32[8,128], index: 3, kind: output, shape index: {}]  }
   0x1   :  { %9 = vsyncpa [#allocation4], 0  ;;  %s16_s14 = sshll.u32 %s279_s1, 4  ;;  %s242_s15 = smov [#allocation2]   ;;  %s17_s14 = int_to_ptr.hbm [resolvable:$true] %s16_s14 }
   0x2   :  { %s18_s16 = sshll.u32 %s242_s15, 4  ;;  %s243_s17 = smov 64   ;;  %s19_s16 = int_to_ptr.vmem [resolvable:$true] %s18_s16 }
   0x3   :  { %s244_s18 = smov 4  }
   0x4   :  { %24 = dma.hbm_to_vmem [thread:$0]  %s17_s14, 1024, %s19_s16, [#allocation3], %s243_s17, %s243_s17, %s244_s18  }
   0x5   :  { %238 = dma.done.wait [#allocation3], 1024  }
   0x6   :  { %239 = vsyncadd [#allocation3], 4294966272  ;;  %v183_v0 = vld [vmem:[#allocation2 + $0x38] sm:$0xff]  ;;  %v182_v1 = vld [vmem:[#allocation2 + $0x30] sm:$0xff]  ;;  %s245_s22 = smov [#allocation5]   ;;  %s134_s26 = sshll.u32 %s281_s3, 4  ;;  %s135_s26 = int_to_ptr.hbm [resolvable:$true] %s134_s26 }
   0x7   :  { %102 = vmatpush.bf16.msra.mxu0 %v183_v0  ;;  %v181_v2 = vld [vmem:[#allocation2 + $0x28] sm:$0xff]  ;;  %v180_v3 = vld [vmem:[#allocation2 + $0x20] sm:$0xff]  ;;  %v179_v4 = vld [vmem:[#allocation2 + $0x18] sm:$0xff]  ;;  %s132_s23 = sshll.u32 %s245_s22, 4  ;;  %s133_s23 = int_to_ptr.vmem [resolvable:$true] %s132_s23 }
   0x8   :  { %v178_v5 = vld [vmem:[#allocation2 + $0x10] sm:$0xff]  ;;  %v177_v6 = vld [vmem:[#allocation2 + $0x8] sm:$0xff]  ;;  %v176_v7 = vld [vmem:[#allocation2] sm:$0xff] }
   0x9   :  { %v37_v8 = vld [vmem:[%s278_s0] sm:$0xf] }
   0xa   :  { %v189_v9 = vld [vmem:[%s280_s2] ss:$0 sm:$0xff] }
   0xb   :  { %103 = vmatpush.bf16.msra.mxu0 %v182_v1 }
   0xf   :  { %104 = vmatpush.bf16.msra.mxu0 %v181_v2 }
  0x13   :  { %105 = vmatpush.bf16.msra.mxu0 %v180_v3 }
  0x17   :  { %106 = vmatpush.bf16.msra.mxu0 %v179_v4 }
  0x1b   :  { %107 = vmatpush.bf16.msra.mxu0 %v178_v5 }
  0x1f   :  { %108 = vmatpush.bf16.msra.mxu0 %v177_v6 }
  0x23   :  { %109 = vmatpush.bf16.msra.mxu0 %v176_v7 }
  0x26   :  { %110 = vmatmul.bf16.vlgmr.msra.gmra.mxu0 %v37_v8 }
  0xa3   :  { %v111_v10 = vpop.f32.mrf.mxu0 }
  0xa4   :  { %v125_v11 = vadd.f32 %v189_v9, %v111_v10 }
  0xa6   :  { %126 = vst [vmem:[#allocation5] sm:$0xff] %v125_v11 }
  0xa7   :  { %137 = dma.vmem_to_hbm [thread:$0]  %s133_s23, 128, %s135_s26, [#allocation4]  }
  0xab   :  { %v113_v12 = vpop.f32.mrf.mxu0 }
  0xac   :  { %240 = dma.done.wait [#allocation4], 128  }
  0xad   :  { %241 = vsyncadd [#allocation4], 4294967168 }
  0xae   :  { %142 = vsyncpa [#allocation3], 1 }
  0xaf   :  { %143 = vsyncpa [#allocation4], 1 }

</bundles_post_ra>
